<compile_context>
chip_gen: v7x
topology: tpu7x:2x2x1
jax: 0.10.0
libtpu: 0.0.40
codegen_flags: <defaults>
</compile_context>

<pallas_src>
import jax
import jax.numpy as jnp
from jax import lax
from jax.experimental import pallas as pl
from jax.experimental.pallas import tpu as pltpu


# ---------------------------------------------------------------------------
# hardware-aware helpers
# ---------------------------------------------------------------------------
def _vmem_limit_bytes():
    """Scoped-VMEM cap: ~3/4 of physical capacity, capped at 96 MiB.
    -> ~96 MiB on v5e/v6e (128 MiB physical), 48 MiB on v7x (64 MiB)."""
    try:
        cap = pltpu.get_tpu_info().vmem_capacity_bytes
    except Exception:  # conservative fallback sized for v7x
        cap = 64 * 1024 * 1024
    return int(max(32 * 1024 * 1024, min(cap * 3 // 4, 96 * 1024 * 1024)))


def _round_up(x, m):
    return (x + m - 1) // m * m


def _pick_tile(size, candidates):
    """Largest candidate that divides `size`, else the full size (legal block)."""
    for c in candidates:
        if size % c == 0:
            return c
    return size


def _row_tile(m):
    """MXU-friendly row tile + padded row count.  Never degrades tm to tiny
    values for large awkward M (pads instead); small M rounds up to a sublane
    multiple."""
    for tm in (512, 256, 128):
        if m % tm == 0:
            return tm, m
    if m <= 256:
        tm = _round_up(m, 8)
        return tm, tm
    return 256, _round_up(m, 256)


# ---------------------------------------------------------------------------
# Pallas kernels
# ---------------------------------------------------------------------------
def _linear_kernel(x_ref, w_ref, o_ref):
    """One (tm, tn) output tile; full K resident, single MXU dot, f32 acc."""
    o_ref[...] = jnp.dot(x_ref[...], w_ref[...],
                         preferred_element_type=jnp.float32).astype(o_ref.dtype)


def _linear_bias_kernel(x_ref, w_ref, b_ref, o_ref):
    acc = jnp.dot(x_ref[...], w_ref[...], preferred_element_type=jnp.float32)
    o_ref[...] = (acc + b_ref[...].astype(jnp.float32)).astype(o_ref.dtype)


def _flash_attn_kernel(q_ref, k_ref, v_ref, o_ref, m_sc, l_sc, acc_sc):
    """Online-softmax attention for one (batch*head, q-block) tile, streaming
    over the KV grid axis (axis 2, "arbitrary").  One head per grid step, so
    all loads/stores/matmuls are full tile width (no per-head lane slicing)."""
    kv = pl.program_id(2)

    @pl.when(kv == 0)
    def _init():
        m_sc[...] = jnp.full_like(m_sc, -jnp.inf)
        l_sc[...] = jnp.zeros_like(l_sc)
        acc_sc[...] = jnp.zeros_like(acc_sc)

    # Softmax scale is pre-folded into the q-projection weights.
    q = q_ref[...]                                   # (tq, D)  bf16
    k = k_ref[...]                                   # (tkv, D) bf16
    # q @ k^T: contract last dim of both operands (no k.T materialisation).
    s = lax.dot_general(q, k, (((1,), (1,)), ((), ())),
                        preferred_element_type=jnp.float32)   # (tq, tkv) f32

    m_prev = m_sc[...]
    m_new = jnp.maximum(m_prev, jnp.max(s, axis=-1, keepdims=True))
    alpha = jnp.exp(m_prev - m_new)
    p = jnp.exp(s - m_new)                                    # f32 softmax math
    l_sc[...] = alpha * l_sc[...] + jnp.sum(p, axis=-1, keepdims=True)
    acc_sc[...] = alpha * acc_sc[...] + jnp.dot(
        p.astype(v_ref.dtype), v_ref[...], preferred_element_type=jnp.float32)
    m_sc[...] = m_new

    @pl.when(kv == pl.num_programs(2) - 1)
    def _store():
        inv_l = pl.reciprocal(l_sc[...], approx=True)          # EUP slot
        o_ref[...] = (acc_sc[...] * inv_l).astype(o_ref.dtype)  # one full-width store


# ---------------------------------------------------------------------------
# pallas_call wrappers
# ---------------------------------------------------------------------------
def pallas_linear(x, w, b=None, *, out_dtype=jnp.float32):
    """x:(M,K) @ w:(K,N) [+ b:(N,)] -> (M,N).

    The weight is VMEM-resident: block (K, tn) with index_map (0, j) and the
    column axis j as the OUTER grid axis, so the weight block index is constant
    over the inner row sweep and is only DMA'd from HBM once per column block.
    No K grid axis => no accumulator scratch / pl.when."""
    m_rows, k_dim = x.shape
    k2, n_cols = w.shape
    assert k_dim == k2
    tm, m_pad = _row_tile(m_rows)
    if m_pad != m_rows:
        x = jnp.pad(x, ((0, m_pad - m_rows), (0, 0)))
    tn = _pick_tile(n_cols, (512, 256, 128))
    grid = (n_cols // tn, m_pad // tm)          # j outer, i inner

    if b is None:
        kernel = _linear_kernel
        in_specs = [pl.BlockSpec((tm, k_dim), lambda j, i: (i, 0)),
                    pl.BlockSpec((k_dim, tn), lambda j, i: (0, j))]
        operands = (x, w)
    else:
        kernel = _linear_bias_kernel
        in_specs = [pl.BlockSpec((tm, k_dim), lambda j, i: (i, 0)),
                    pl.BlockSpec((k_dim, tn), lambda j, i: (0, j)),
                    pl.BlockSpec((1, tn), lambda j, i: (0, j))]
        operands = (x, w, b.reshape(1, n_cols))

    out = pl.pallas_call(
        kernel,
        out_shape=jax.ShapeDtypeStruct((m_pad, n_cols), out_dtype),
        grid_spec=pltpu.PrefetchScalarGridSpec(
            num_scalar_prefetch=0,
            grid=grid,
            in_specs=in_specs,
            out_specs=pl.BlockSpec((tm, tn), lambda j, i: (i, j))),
        compiler_params=pltpu.CompilerParams(
            dimension_semantics=("parallel", "parallel"),
            vmem_limit_bytes=_vmem_limit_bytes()),
    )(*operands)
    return out[:m_rows] if m_pad != m_rows else out


def pallas_flash_attention(qh, kh, vh, *, out_dtype=jnp.bfloat16):
    """qh: (B*H, N, D), kh/vh: (B*H, M, D) head-leading layout -> (B*H, N, D)."""
    bh, n_q, d = qh.shape
    bh2, m_kv, d2 = kh.shape
    assert bh2 == bh and d2 == d
    # tq=256 / tkv=128 keeps the live (tq, tkv) f32 score tile at 128 KiB
    # (half the vreg file) -- avoids the 256x256 spill case.
    tq = _pick_tile(n_q, (256, 128))
    tkv = _pick_tile(m_kv, (128, 256))
    grid = (bh, n_q // tq, m_kv // tkv)
    # TODO(synk): no ragged-tail masking; KV length must divide tkv (else a
    # full-length KV block is used).  Do not pad KV with zeros upstream.

    return pl.pallas_call(
        _flash_attn_kernel,
        out_shape=jax.ShapeDtypeStruct((bh, n_q, d), out_dtype),
        grid_spec=pltpu.PrefetchScalarGridSpec(
            num_scalar_prefetch=0,
            grid=grid,
            in_specs=[
                pl.BlockSpec((pl.Squeezed(), tq, d), lambda b, i, j: (b, i, 0)),
                pl.BlockSpec((pl.Squeezed(), tkv, d), lambda b, i, j: (b, j, 0)),
                pl.BlockSpec((pl.Squeezed(), tkv, d), lambda b, i, j: (b, j, 0)),
            ],
            out_specs=pl.BlockSpec((pl.Squeezed(), tq, d),
                                   lambda b, i, j: (b, i, 0)),
            scratch_shapes=[pltpu.VMEM((tq, 1), jnp.float32),    # running max
                            pltpu.VMEM((tq, 1), jnp.float32),    # running sum
                            pltpu.VMEM((tq, d), jnp.float32)]),  # accumulator
        compiler_params=pltpu.CompilerParams(
            dimension_semantics=("parallel", "parallel", "arbitrary"),
            vmem_limit_bytes=_vmem_limit_bytes()),
    )(qh, kh, vh)


# ---------------------------------------------------------------------------
# Module-equivalent forward pass
# ---------------------------------------------------------------------------
def attention_qkv_forward(params, q, k, v, *, heads, dim_head):
    b, n, dim = q.shape
    bk, m, _ = k.shape
    assert bk == b, "batch dims must match for the attention einsum"
    inner_dim = heads * dim_head
    scale = dim_head ** (-0.5)

    # Softmax scale folded into the q-projection weight (one-time O(K*N)
    # multiply instead of a per-KV-step multiply inside the attention kernel).
    wq_scaled = (params["wq"].astype(jnp.float32) * scale).astype(jnp.bfloat16)

    # Cast activations to bf16 once here: halves projection-input HBM traffic
    # and removes per-tile VPU casts in the kernels; matmuls accumulate in f32.
    q2 = q.reshape(b * n, dim).astype(jnp.bfloat16)
    k2 = k.reshape(bk * m, dim).astype(jnp.bfloat16)
    v2 = v.reshape(bk * m, dim).astype(jnp.bfloat16)

    # q/k/v projections (Linear, no bias) -> bf16 feeding the attention core.
    # TODO(synk): wq|wk|wv concat fusion is not applicable here because q, k, v
    # are three distinct input tensors (cross-attention), not one shared x.
    qp = pallas_linear(q2, wq_scaled, out_dtype=jnp.bfloat16)
    kp = pallas_linear(k2, params["wk"], out_dtype=jnp.bfloat16)
    vp = pallas_linear(v2, params["wv"], out_dtype=jnp.bfloat16)

    # Head-leading layout (the module's own 'b n (h d) -> b h n d'): one head
    # per attention grid step => no per-head lane slices in the hot KV loop.
    qh = qp.reshape(b, n, heads, dim_head).transpose(0, 2, 1, 3)
    qh = qh.reshape(b * heads, n, dim_head)
    kh = kp.reshape(bk, m, heads, dim_head).transpose(0, 2, 1, 3)
    kh = kh.reshape(bk * heads, m, dim_head)
    vh = vp.reshape(bk, m, heads, dim_head).transpose(0, 2, 1, 3)
    vh = vh.reshape(bk * heads, m, dim_head)

    out = pallas_flash_attention(qh, kh, vh, out_dtype=jnp.bfloat16)

    # 'b h n d -> b n (h d)' then to_out: Linear(inner_dim, dim) with bias;
    # Dropout(p=0.0) is the identity.
    out = out.reshape(b, heads, n, dim_head).transpose(0, 2, 1, 3)
    out = out.reshape(b * n, inner_dim)
    out = pallas_linear(out, params["wo"], params["bo"], out_dtype=jnp.float32)
    return out.reshape(b, n, dim)


def init_params(key, dim, heads, dim_head):
    """Init mimicking PyTorch Linear defaults (uniform +-1/sqrt(fan_in)).
    Weights stored as (in, out) = transpose of torch's (out, in), in bf16
    (MXU operand dtype); bias kept in f32."""
    inner_dim = heads * dim_head
    kq, kk, kv, ko, kb = jax.random.split(key, 5)
    bd = 1.0 / (dim ** 0.5)
    bo = 1.0 / (inner_dim ** 0.5)
    return {
        "wq": jax.random.uniform(kq, (dim, inner_dim), jnp.float32,
                                 -bd, bd).astype(jnp.bfloat16),
        "wk": jax.random.uniform(kk, (dim, inner_dim), jnp.float32,
                                 -bd, bd).astype(jnp.bfloat16),
        "wv": jax.random.uniform(kv, (dim, inner_dim), jnp.float32,
                                 -bd, bd).astype(jnp.bfloat16),
        "wo": jax.random.uniform(ko, (inner_dim, dim), jnp.float32,
                                 -bo, bo).astype(jnp.bfloat16),
        "bo": jax.random.uniform(kb, (dim,), jnp.float32, -bo, bo),
    }


def reference_forward(params, q, k, v, *, heads, dim_head):
    """Pure-JAX f32 reference (same params, f32 math) for correctness checks."""
    b, n, dim = q.shape
    bk, m, _ = k.shape
    scale = dim_head ** (-0.5)
    wq = params["wq"].astype(jnp.float32)
    wk = params["wk"].astype(jnp.float32)
    wv = params["wv"].astype(jnp.float32)
    wo = params["wo"].astype(jnp.float32)
    qp = (q.reshape(b * n, dim) @ wq).reshape(b, n, heads, dim_head)
    kp = (k.reshape(bk * m, dim) @ wk).reshape(bk, m, heads, dim_head)
    vp = (v.reshape(bk * m, dim) @ wv).reshape(bk, m, heads, dim_head)
    qh = qp.transpose(0, 2, 1, 3)
    kh = kp.transpose(0, 2, 1, 3)
    vh = vp.transpose(0, 2, 1, 3)
    dots = jnp.einsum("bhid,bhjd->bhij", qh, kh) * scale
    attn = jax.nn.softmax(dots, axis=-1)
    out = jnp.einsum("bhij,bhjd->bhid", attn, vh)
    out = out.transpose(0, 2, 1, 3).reshape(b * n, heads * dim_head)
    out = out @ wo + params["bo"]
    return out.reshape(b, n, dim)


if __name__ == "__main__":
    dim, heads, dim_head = 32, 2, 16
    b, n, m = 2, 8, 8

    key = jax.random.PRNGKey(0)
    kp_, kq_, kk_, kv_ = jax.random.split(key, 4)
    params = init_params(kp_, dim, heads, dim_head)

    q = jax.random.normal(kq_, (b, n, dim), jnp.float32)
    k = jax.random.normal(kk_, (b, m, dim), jnp.float32)
    v = jax.random.normal(kv_, (b, m, dim), jnp.float32)

    out = attention_qkv_forward(params, q, k, v, heads=heads, dim_head=dim_head)
    out = jax.block_until_ready(out)

    ref = reference_forward(params, q, k, v, heads=heads, dim_head=dim_head)
    assert out.shape == (b, n, dim)
    # bf16 MXU operands + approx reciprocal -> compare against f32 reference
    # with a bf16-appropriate tolerance.
    assert jnp.allclose(out, ref, rtol=2e-2, atol=2e-2), "mismatch vs reference"

    print("KERNEL_OK")
</pallas_src>

<mosaic_0001>
module attributes {stable_mosaic.version = 11 : i64} {
  func.func @_linear_kernel(%arg0: i32, %arg1: i32, %arg2: memref<16x32xbf16, #tpu.memory_space<vmem>>, %arg3: memref<32x32xbf16, #tpu.memory_space<vmem>>, %arg4: memref<16x32xbf16, #tpu.memory_space<vmem>>) attributes {dimension_semantics = [#tpu.dimension_semantics<parallel>, #tpu.dimension_semantics<parallel>], iteration_bounds = array<i64: 1, 1>, scalar_prefetch = 0 : i64, scratch_operands = 0 : i64, tpu.core_type = #tpu.core_type<tc>, window_params = [{transform_indices = @transform_0, window_bounds = array<i64: 16, 32>}, {transform_indices = @transform_1, window_bounds = array<i64: 32, 32>}, {transform_indices = @transform_2, window_bounds = array<i64: 16, 32>}]} {
    %c0 = arith.constant 0 : index
    %c0_0 = arith.constant 0 : index
    %0 = vector.load %arg2[%c0, %c0_0] : memref<16x32xbf16, #tpu.memory_space<vmem>>, vector<16x32xbf16>
    %c0_1 = arith.constant 0 : index
    %c0_2 = arith.constant 0 : index
    %1 = vector.load %arg3[%c0_1, %c0_2] : memref<32x32xbf16, #tpu.memory_space<vmem>>, vector<32x32xbf16>
    %cst = arith.constant dense<0.000000e+00> : vector<16x32xf32>
    %2 = tpu.matmul %0, %1, %cst {dimension_numbers = #tpu.dot_dimension_numbers<[1], [0], [0], [1], [0, 0, 1, 1], [], []>} : vector<16x32xbf16>, vector<32x32xbf16>, vector<16x32xf32> -> vector<16x32xf32>
    %3 = arith.truncf %2 : vector<16x32xf32> to vector<16x32xbf16>
    %c0_3 = arith.constant 0 : index
    %c0_4 = arith.constant 0 : index
    %4 = vector.load %arg4[%c0_3, %c0_4] : memref<16x32xbf16, #tpu.memory_space<vmem>>, vector<16x32xbf16>
    tpu.vector_store %arg4[%c0_3, %c0_4], %3 {strides = array<i32>} : memref<16x32xbf16, #tpu.memory_space<vmem>>, vector<16x32xbf16>,
    return
  }
  func.func @transform_0(%arg0: i32, %arg1: i32) -> (i32, i32) {
    %c0_i32 = arith.constant 0 : i32
    %c0_i32_0 = arith.constant 0 : i32
    return %arg1, %c0_i32 : i32, i32
  }
  func.func @transform_1(%arg0: i32, %arg1: i32) -> (i32, i32) {
    %c0_i32 = arith.constant 0 : i32
    %c0_i32_0 = arith.constant 0 : i32
    return %c0_i32, %arg0 : i32, i32
  }
  func.func @transform_2(%arg0: i32, %arg1: i32) -> (i32, i32) {
    %c0_i32 = arith.constant 0 : i32
    return %arg1, %arg0 : i32, i32
  }
}

</mosaic_0001>

<bundles_post_ra>
// kernel: tpu_custom_call.1
= control target key start
LH: loop header
LB: loop body
LE: loop exit
PB: predicated region body
PF: predicated region fallthrough
CT: control target
= control target key end

     0   :  { %7 = vsyncpa [#allocation3], 0  ;;  %s306_s0 = inlined_call_operand.hbm [shape: bf16[16,32], index: 0, kind: input, shape index: {}]   ;;  %s307_s1 = inlined_call_operand.hbm [shape: bf16[32,32], index: 1, kind: input, shape index: {}]   ;;  %s308_s2 = inlined_call_operand.hbm [shape: bf16[16,32], index: 2, kind: output, shape index: {}]  }
   0x1   :  { %8 = vsyncpa [#allocation6], 0 }
   0x2   :  { %9 = vsyncpa [#allocation4], 0  ;;  %s239_s9 = smov [#allocation2]   ;;  %s167_s13 = scalar_lea.hbm %s306_s0, 128 }
   0x3   :  { %s15_s10 = sshll.u32 %s239_s9, 4  ;;  %p168_p0 = scmp.ne.s32.totalorder %s306_s0, %s167_s13  ;;  %s16_s10 = int_to_ptr.vmem [resolvable:$true] %s15_s10 }
   0x4   :  { %p171_p1 = scmp.lt.u32.totalorder %s167_s13, %s306_s0 }
   0x6   :  { %p173_p2 = pnand %p171_p1, %p168_p0 }
   0x8   :  { %176 = shalt.err (!%p173_p2)
}
   0x9   :  { %s177_s18 = scalar_lea.vmem %s16_s10, 128  ;;  %p182_p4 = scmp.lt.s32.totalorder %s16_s10, %s16_s10 }
   0xa   :  { %p178_p3 = scmp.ne.s32.totalorder %s16_s10, %s177_s18  ;;  %p183_p5 = scmp.lt.s32.totalorder %s177_s18, %s177_s18 }
   0xc   :  { %p184_p6 = por %p183_p5, %p182_p4 }
   0xe   :  { %p185_p7 = pnand %p184_p6, %p178_p3 }
  0x10   :  { %188 = shalt.err (!%p185_p7)
}
  0x11   :  { %s240_s19 = smov 64   ;;  %s241_s20 = smov 4  }
  0x12   :  { %21 = dma.hbm_to_vmem [thread:$0]  %s306_s0, 128, %s16_s10, [#allocation3], %s240_s19, %s240_s19, %s241_s20  }
  0x13   :  { %s242_s23 = smov [#allocation5]   ;;  %s189_s27 = scalar_lea.hbm %s307_s1, 256 }
  0x14   :  { %s27_s24 = sshll.u32 %s242_s23, 4  ;;  %p190_p8 = scmp.ne.s32.totalorder %s307_s1, %s189_s27  ;;  %s28_s24 = int_to_ptr.vmem [resolvable:$true] %s27_s24 }
  0x15   :  { %p193_p9 = scmp.lt.u32.totalorder %s189_s27, %s307_s1 }
  0x17   :  { %p195_p10 = pnand %p193_p9, %p190_p8 }
  0x19   :  { %198 = shalt.err (!%p195_p10)
}
  0x1a   :  { %s199_s4 = scalar_lea.vmem %s28_s24, 256  ;;  %p204_p12 = scmp.lt.s32.totalorder %s28_s24, %s28_s24 }
  0x1b   :  { %p200_p11 = scmp.ne.s32.totalorder %s28_s24, %s199_s4  ;;  %p205_p13 = scmp.lt.s32.totalorder %s199_s4, %s199_s4 }
  0x1d   :  { %p206_p0 = por %p205_p13, %p204_p12 }
  0x1f   :  { %p207_p1 = pnand %p206_p0, %p200_p11 }
  0x21   :  { %210 = shalt.err (!%p207_p1)
}
  0x22   :  { %33 = dma.hbm_to_vmem [thread:$0]  %s307_s1, 256, %s28_s24, [#allocation6], %s240_s19, %s240_s19, %s241_s20  }
  0x23   :  { %233 = dma.done.wait [#allocation3], 128  }
  0x24   :  { %234 = vsyncadd [#allocation3], 4294967168 }
  0x25   :  { %235 = dma.done.wait [#allocation6], 256  }
  0x26   :  { %236 = vsyncadd [#allocation6], 4294967040  ;;  %v243_v0 = vmov 0.0   ;;  %vm244_vm0 = vmmov 0   ;;  %v164_v1 = vld [vmem:[#allocation5] sm:$0xff]   ;;  %v165_v2 = vld [vmem:[#allocation5 + $0x8] sm:$0xff]  }
  0x27   :  { %149 = vmatprep.subr.bf16.mxu0 %v243_v0  ;;  %153 = vmatprep.mubr.msk.bf16.mxu0 %vm244_vm0, %v243_v0  ;;  %v166_v3 = vld [vmem:[#allocation2] sm:$0xff]   ;;  %vm64_vm1 = vcmask 261120   ;;  %vm117_vm2 = vcmask 257024   ;;  %s245_s6 = smov [#allocation7]  }
  0x28   :  { %150 = vmatpush3.bf16.msra.mxu0 %v164_v1  ;;  %s125_s1 = sshll.u32 %s245_s6, 4  ;;  %s126_s1 = int_to_ptr.vmem [resolvable:$true] %s125_s1 }
  0x29   :  { %151 = vmatprep.subr.bf16.mxu0 %v243_v0  ;;  %s211_s7 = scalar_lea.vmem %s126_s1, 128  ;;  %p216_p3 = scmp.lt.s32.totalorder %s126_s1, %s126_s1 }
  0x2a   :  { %p212_p2 = scmp.ne.s32.totalorder %s126_s1, %s211_s7  ;;  %p217_p4 = scmp.lt.s32.totalorder %s211_s7, %s211_s7 }
  0x2c   :  { %152 = vmatpush3.bf16.msra.mxu0 %v165_v2  ;;  %p218_p5 = por %p217_p4, %p216_p3 }
  0x2e   :  { %p219_p6 = pnand %p218_p5, %p212_p2 }
  0x2f   :  { %154 = vmatmul.mubr.msk.bf16.vlgmr.msra.gmra.mrb[0].mxu0 %vm64_vm1, %v166_v3 }
 0x102   :  { %v102_v4 = vpop.f32.mrb[0].mxu0 }
 0x103   :  { %v144_v5 = vpack.c.bf16 %v102_v4, %v102_v4  ;;  %v155_v6 = vpop.f32.mrb[1].mxu0 }
 0x104   :  { %v105_v7 = vpop.f32.mrb[2].mxu0 }
 0x105   :  { %v145_v8 = vpack.c.bf16 %v105_v7, %v105_v7  ;;  %v156_v9 = vpop.f32.mrb[3].mxu0  ;;  %118 = vst.msk [vmem:[#allocation7] sm:$0xf] %vm117_vm2, %v144_v5 }
 0x107   :  { %119 = vst.msk [vmem:[#allocation7 + $0x4] sm:$0xf] %vm117_vm2, %v145_v8 }
 0x108   :  { %222 = shalt.err (!%p219_p6)
}
 0x109   :  { %s223_s10 = scalar_lea.hbm %s308_s2, 128 }
 0x10a   :  { %p224_p7 = scmp.ne.s32.totalorder %s308_s2, %s223_s10  ;;  %p227_p8 = scmp.lt.u32.totalorder %s223_s10, %s308_s2 }
 0x10c   :  { %p229_p9 = pnand %p227_p8, %p224_p7 }
 0x10e   :  { %232 = shalt.err (!%p229_p9)
}
 0x10f   :  { %131 = dma.vmem_to_hbm [thread:$0]  %s126_s1, 128, %s308_s2, [#allocation4], %s240_s19, %s240_s19, %s241_s20  }
 0x110   :  { %237 = dma.done.wait [#allocation4], 128  }
 0x111   :  { %238 = vsyncadd [#allocation4], 4294967168 }
 0x112   :  { %135 = vsyncpa [#allocation3], 1 }
 0x113   :  { %136 = vsyncpa [#allocation6], 1 }
 0x114   :  { %137 = vsyncpa [#allocation4], 1 }

</bundles_post_ra>
